<compile_context>
chip_gen: v7x
topology: tpu7x:2x2x1
jax: 0.10.0
libtpu: 0.0.40
codegen_flags: <defaults>
</compile_context>

<pallas_src>
import functools

import jax
import jax.numpy as jnp
from jax.experimental import pallas as pl
from jax.experimental.pallas import tpu as pltpu


def _round_up(x, m):
    return (x + m - 1) // m * m


def _vmem_capacity_bytes():
    """Per-TensorCore VMEM capacity; conservative 64 MiB fallback (v7x)."""
    try:
        cap = int(pltpu.get_tpu_info().vmem_capacity_bytes)
        if cap > 0:
            return cap
    except Exception:
        pass
    return 64 << 20


def _pick_tile_v(V, H, emb_bytes, B_pad, vmem_cap, buffers, desired=None):
    """Largest multiple of 128 <= desired whose buffered embedding tiles +
    double-buffered f32 output tile fit ~55% of this chip's VMEM."""
    if desired is None:
        desired = 4096 if vmem_cap >= (96 << 20) else 2048
    budget = int(0.55 * vmem_cap)
    v_ceil = _round_up(max(V, 128), 128)
    tv = min(desired, v_ceil)
    tv -= tv % 128
    tv = max(tv, 128)

    def cost(t):
        return buffers * t * H * emb_bytes + 2 * B_pad * t * 4

    while tv > 128 and cost(tv) > budget:
        tv -= 128
    return tv


def _logits_kernel(*refs, softcap, has_bias, has_temp, tile_v, valid_v,
                   needs_mask):
    # ref order: hidden, emb_tile, [bias(resident)], [inv_temp],
    #            out_tile, tile_max, tile_argmax, tile_sumexp
    it = iter(refs)
    hidden_ref = next(it)                          # (B_pad, H)   native dtype
    emb_ref = next(it)                             # (TV, H)      native dtype
    bias_ref = next(it) if has_bias else None      # (1, V_pad)   f32, resident
    inv_temp_ref = next(it) if has_temp else None  # (B_pad, 1)   f32, resident
    out_ref = next(it)                             # (B_pad, TV)  f32
    max_ref = next(it)                             # (1, B_pad, 1) f32
    arg_ref = next(it)                             # (1, B_pad, 1) i32
    sumexp_ref = next(it)                          # (1, B_pad, 1) f32

    j = pl.program_id(0)

    # MXU matmul in native dtype (bf16 hits native MXU rate), f32 accumulate.
    logits = jax.lax.dot_general(
        hidden_ref[...], emb_ref[...],
        dimension_numbers=(((1,), (1,)), ((), ())),
        preferred_element_type=jnp.float32)

    if has_bias:
        off = pl.multiple_of(j * tile_v, 128)
        logits = logits + bias_ref[:, pl.ds(off, tile_v)]

    if softcap is not None:
        inv_cap = jnp.float32(1.0 / softcap)
        logits = jnp.tanh(logits * inv_cap) * jnp.float32(softcap)

    if has_temp:
        # PyTorch: logits.div_(temperatures.unsqueeze(1)); inv_temp precomputed.
        logits = logits * inv_temp_ref[...]

    out_ref[...] = logits

    # Per-tile partials: running max / argmax (greedy path) and sum-exp
    # (softmax normalizer), so the wrapper never re-reads the (B, V) logits.
    col = jax.lax.broadcasted_iota(jnp.int32, logits.shape, 1) + j * tile_v
    if needs_mask:
        masked = jnp.where(col < valid_v, logits, -jnp.inf)
    else:
        masked = logits
    tile_max = jnp.max(masked, axis=-1, keepdims=True)                 # (B,1)
    tile_arg = jnp.min(jnp.where(masked == tile_max, col, jnp.int32(2 ** 30)),
                       axis=-1, keepdims=True)                         # (B,1)
    tile_sum = jnp.sum(jnp.exp(masked - tile_max), axis=-1, keepdims=True)

    max_ref[...] = tile_max[None]
    arg_ref[...] = tile_arg[None]
    sumexp_ref[...] = tile_sum[None]


def compute_logits(hidden, embedding, embedding_bias, temperatures, *,
                   softcap, tile_v=None):
    """hidden: (B, H), embedding: (V, H).

    Returns (logits (B, V) f32, tile_max (B, T) f32, tile_argmax (B, T) i32,
    tile_sumexp (B, T) f32) where T = number of vocab tiles."""
    B, H = hidden.shape
    V, H2 = embedding.shape
    assert H == H2

    # Cheap (B x H) cast so the dot operands share the table's native dtype;
    # the big V x H table itself is never upcast / copied.
    hidden = hidden.astype(embedding.dtype)

    # Pad the batch to a full 8-sublane vreg height -> unmasked vld/vst.
    B_pad = max(8, _round_up(B, 8))
    if B_pad != B:
        hidden = jnp.pad(hidden, ((0, B_pad - B), (0, 0)))

    emb_bytes = jnp.dtype(embedding.dtype).itemsize
    vmem_cap = _vmem_capacity_bytes()
    buffers = 3 if vmem_cap >= (96 << 20) else 2     # deeper pipeline on 128MiB parts
    if tile_v is None:
        tile_v = _pick_tile_v(V, H, emb_bytes, B_pad, vmem_cap, buffers)
    assert tile_v % 128 == 0

    n_tiles = (V + tile_v - 1) // tile_v
    V_pad = n_tiles * tile_v

    has_bias = embedding_bias is not None
    has_temp = temperatures is not None

    args = [hidden, embedding]
    in_specs_common = [
        pl.BlockSpec((B_pad, H), lambda j: (0, 0)),      # hidden (VMEM resident)
    ]
    if has_bias:
        bias = embedding_bias.astype(jnp.float32).reshape(1, V)
        if V_pad != V:
            bias = jnp.pad(bias, ((0, 0), (0, V_pad - V)))
        args.append(bias)
    if has_temp:
        t = temperatures.astype(jnp.float32).reshape(B, 1)
        # Guard per-row temp==0 (mixed greedy/sampled batches): clamp so the
        # kernel never divides by zero; tiny temp ~= argmax behavior.
        inv_temp = 1.0 / jnp.maximum(t, jnp.float32(1e-6))
        if B_pad != B:
            inv_temp = jnp.pad(inv_temp, ((0, B_pad - B), (0, 0)),
                               constant_values=1.0)
        args.append(inv_temp)

    kernel = functools.partial(
        _logits_kernel, softcap=softcap, has_bias=has_bias, has_temp=has_temp,
        tile_v=tile_v, valid_v=V, needs_mask=(V_pad != V))

    out_shape = (
        jax.ShapeDtypeStruct((B_pad, V_pad), jnp.float32),
        jax.ShapeDtypeStruct((n_tiles, B_pad, 1), jnp.float32),
        jax.ShapeDtypeStruct((n_tiles, B_pad, 1), jnp.int32),
        jax.ShapeDtypeStruct((n_tiles, B_pad, 1), jnp.float32),
    )
    out_specs = [
        pl.BlockSpec((B_pad, tile_v), lambda j: (0, j)),
        pl.BlockSpec((1, B_pad, 1), lambda j: (j, 0, 0)),
        pl.BlockSpec((1, B_pad, 1), lambda j: (j, 0, 0)),
        pl.BlockSpec((1, B_pad, 1), lambda j: (j, 0, 0)),
    ]

    def _emb_spec(buf_count):
        imap = lambda j: (j, 0)
        if buf_count > 2:
            try:
                return pl.BlockSpec((tile_v, H), imap,
                                    pipeline_mode=pl.Buffered(buf_count))
            except Exception:
                pass
        return pl.BlockSpec((tile_v, H), imap)

    def _run(buf_count):
        in_specs = [in_specs_common[0], _emb_spec(buf_count)]
        if has_bias:
            in_specs.append(pl.BlockSpec((1, V_pad), lambda j: (0, 0)))
        if has_temp:
            in_specs.append(pl.BlockSpec((B_pad, 1), lambda j: (0, 0)))

        vmem_needed = (buf_count * tile_v * H * emb_bytes   # embedding tiles
                       + 2 * B_pad * tile_v * 4             # logits tiles (x2)
                       + B_pad * H * emb_bytes              # resident hidden
                       + (V_pad * 4 if has_bias else 0)     # resident bias
                       + (B_pad * 4 if has_temp else 0)     # resident inv_temp
                       + 6 * 2 * B_pad * 4)                 # tiny partial tiles
        vmem_limit = int(min(max(int(1.4 * vmem_needed), 16 << 20),
                             int(0.9 * vmem_cap)))

        return pl.pallas_call(
            kernel,
            out_shape=out_shape,
            grid_spec=pltpu.PrefetchScalarGridSpec(
                num_scalar_prefetch=0,
                grid=(n_tiles,),
                in_specs=in_specs,
                out_specs=out_specs,
            ),
            compiler_params=pltpu.CompilerParams(
                # "parallel" lets v7x's 2 TensorCores split the vocab stream;
                # a no-op (not harmful) on single-TC v5e/v6e.
                dimension_semantics=("parallel",),
                vmem_limit_bytes=vmem_limit,
            ),
        )(*args)

    try:
        logits_pad, pmax, parg, psum = _run(buffers)
    except Exception:
        if buffers == 2:
            raise
        logits_pad, pmax, parg, psum = _run(2)   # safety net: drop to 2 buffers

    logits = logits_pad[:B, :V]
    tile_max = jnp.transpose(pmax[:, :B, 0])       # (B, n_tiles)
    tile_arg = jnp.transpose(parg[:, :B, 0])
    tile_sumexp = jnp.transpose(psum[:, :B, 0])
    return logits, tile_max, tile_arg, tile_sumexp


def _topk_filter(logits, logZ, top_ps, top_ks, k_cap):
    """Top-p/top-k filtering restricted to the k_cap most probable tokens,
    using full-vocab softmax probabilities (exact vs the full-sort reference
    whenever k_cap >= max(top_ks))."""
    V = logits.shape[-1]
    k_cap = min(int(k_cap), V)
    top_vals, top_idx = jax.lax.top_k(logits, k_cap)        # descending order
    probs_sort = jnp.exp(top_vals - logZ[:, None])          # full-vocab probs
    probs_sum = jnp.cumsum(probs_sort, axis=-1)
    top_ps_mask = (probs_sum - probs_sort) > top_ps[:, None]
    probs_sort = jnp.where(top_ps_mask, 0.0, probs_sort)
    ks = jnp.minimum(top_ks.astype(jnp.int32), k_cap)
    top_ks_mask = jnp.arange(k_cap, dtype=jnp.int32)[None, :] >= ks[:, None]
    probs_sort = jnp.where(top_ks_mask, 0.0, probs_sort)
    probs_sort = probs_sort / probs_sort.sum(axis=-1, keepdims=True)
    return probs_sort, top_idx


def sampler_forward(embedding, hidden_states, output_positions, temperatures,
                    top_ps, top_ks, embedding_bias=None, *,
                    final_logit_softcapping=30.0, key=None, tile_v=None,
                    top_k_cap=1024):
    """Mirrors Sampler.forward semantics.

    embedding: (V, H); hidden_states: (B, S, H); output_positions: (1,) int;
    temperatures/top_ps: (B,) float or None; top_ks: (B,) int.
    Returns (next_token_ids (B,), logits (B, V) float32).
    """
    # hidden_states.index_select(1, output_positions).squeeze(1)
    hidden = jnp.squeeze(jnp.take(hidden_states, output_positions, axis=1),
                         axis=1)

    logits, tile_max, tile_arg, tile_sumexp = compute_logits(
        hidden, embedding, embedding_bias, temperatures,
        softcap=final_logit_softcapping, tile_v=tile_v)

    if temperatures is None:
        # Fused greedy argmax: reduce the tiny (B, n_tiles) per-tile partials
        # instead of re-reading the full (B, V) f32 logits.
        best_tile = jnp.argmax(tile_max, axis=-1)
        next_token_ids = jnp.take_along_axis(
            tile_arg, best_tile[:, None], axis=-1)[:, 0]
        return next_token_ids, logits

    # Full-vocab log-normalizer from the kernel's per-tile (max, sum-exp).
    gmax = jnp.max(tile_max, axis=-1)
    logZ = gmax + jnp.log(
        jnp.sum(tile_sumexp * jnp.exp(tile_max - gmax[:, None]), axis=-1))

    # TODO(synk): export per-tile partial top-k from the kernel to shrink the
    # lax.top_k input further; full-vocab sort/multinomial stays in XLA.
    probs_sort, top_idx = _topk_filter(logits, logZ, top_ps, top_ks, top_k_cap)

    if key is None:
        key = jax.random.PRNGKey(0)
    pos = jax.random.categorical(key, jnp.log(probs_sort), axis=-1)   # (B,)
    next_token_ids = jnp.take_along_axis(top_idx, pos[:, None], axis=-1)[:, 0]
    return next_token_ids, logits


# ----------------------------- references -----------------------------------

def _ref_logits(hidden, embedding, bias, temperatures, softcap):
    h = hidden.astype(embedding.dtype)
    logits = jnp.dot(h, embedding.T, preferred_element_type=jnp.float32)
    if bias is not None:
        logits = logits + bias.astype(jnp.float32)
    if softcap is not None:
        logits = jnp.tanh(logits / softcap) * softcap
    if temperatures is not None:
        t = jnp.maximum(temperatures.astype(jnp.float32), 1e-6)
        logits = logits / t[:, None]
    return logits


def _ref_filtered_probs(logits, top_ps, top_ks):
    """Filtered/renormalized probs via the original full-vocab sort algorithm."""
    probs = jax.nn.softmax(logits.astype(jnp.float32), axis=-1)
    order = jnp.argsort(-probs, axis=-1)
    probs_sort = jnp.take_along_axis(probs, order, axis=-1)
    probs_sum = jnp.cumsum(probs_sort, axis=-1)
    probs_sort = jnp.where((probs_sum - probs_sort) > top_ps[:, None],
                           0.0, probs_sort)
    V = logits.shape[-1]
    probs_sort = jnp.where(jnp.arange(V)[None, :] >= top_ks[:, None],
                           0.0, probs_sort)
    probs_sort = probs_sort / probs_sort.sum(axis=-1, keepdims=True)
    inv = jnp.argsort(order, axis=-1)
    return jnp.take_along_axis(probs_sort, inv, axis=-1)


if __name__ == "__main__":
    B, S, H, V = 4, 8, 64, 384

    root = jax.random.PRNGKey(0)
    k_emb, k_hid, k_bias, k_sample = jax.random.split(root, 4)

    embedding = jax.random.normal(k_emb, (V, H), jnp.float32) * 0.05
    hidden_states = jax.random.normal(k_hid, (B, S, H), jnp.float32)
    embedding_bias = jax.random.normal(k_bias, (V,), jnp.float32) * 0.01
    output_positions = jnp.array([S - 1], jnp.int32)
    temperatures = jnp.full((B,), 0.8, jnp.float32)
    top_ps = jnp.full((B,), 0.95, jnp.float32)
    top_ks = jnp.full((B,), 64, jnp.int32)

    hidden_last = hidden_states[:, S - 1, :]
    ref = _ref_logits(hidden_last, embedding, embedding_bias, temperatures, 30.0)

    # --- Case A: sampling path, auto tile (f32 table, bias, temperatures) ---
    next_ids, logits = sampler_forward(
        embedding, hidden_states, output_positions, temperatures,
        top_ps, top_ks, embedding_bias=embedding_bias, key=k_sample)
    jax.block_until_ready((next_ids, logits))
    assert next_ids.shape == (B,) and logits.shape == (B, V)
    assert bool(jnp.all((next_ids >= 0) & (next_ids < V)))
    assert jnp.allclose(logits, ref, atol=1e-2, rtol=1e-2), \
        float(jnp.max(jnp.abs(logits - ref)))

    # --- Case B: forced tile_v=256 -> 2 tiles with a padded tail; validate
    #     the kernel's per-tile max/argmax/sum-exp partials & top-k filter ---
    logits_b, tmax, targ, tsum = compute_logits(
        hidden_last, embedding, embedding_bias, temperatures,
        softcap=30.0, tile_v=256)
    jax.block_until_ready(logits_b)
    assert logits_b.shape == (B, V)
    assert jnp.allclose(logits_b, ref, atol=1e-2, rtol=1e-2)

    gmax = jnp.max(tmax, axis=-1)
    logZ = gmax + jnp.log(jnp.sum(tsum * jnp.exp(tmax - gmax[:, None]), axis=-1))
    logZ_ref = jax.scipy.special.logsumexp(logits_b, axis=-1)
    assert jnp.allclose(logZ, logZ_ref, atol=1e-3, rtol=1e-3)

    best_tile = jnp.argmax(tmax, axis=-1)
    fused_arg = jnp.take_along_axis(targ, best_tile[:, None], axis=-1)[:, 0]
    assert bool(jnp.all(fused_arg == jnp.argmax(logits_b, axis=-1)))

    probs_sort, top_idx = _topk_filter(logits_b, logZ, top_ps, top_ks, V)
    scattered = jnp.zeros((B, V), jnp.float32).at[
        jnp.arange(B)[:, None], top_idx].set(probs_sort)
    assert jnp.allclose(scattered, _ref_filtered_probs(logits_b, top_ps, top_ks),
                        atol=2e-3)

    # --- Case C: greedy path (bf16 table, no bias, temperatures None),
    #     forced tile_v=256 so the fused argmax spans multiple tiles ---
    embedding_bf16 = embedding.astype(jnp.bfloat16)
    greedy_ids, greedy_logits = sampler_forward(
        embedding_bf16, hidden_states, output_positions, None,
        top_ps, top_ks, tile_v=256)
    jax.block_until_ready((greedy_ids, greedy_logits))
    assert greedy_ids.shape == (B,) and greedy_logits.shape == (B, V)
    assert greedy_logits.dtype == jnp.float32
    ref_g = _ref_logits(hidden_last, embedding_bf16, None, None, 30.0)
    assert jnp.allclose(greedy_logits, ref_g, atol=1e-2, rtol=1e-2), \
        float(jnp.max(jnp.abs(greedy_logits - ref_g)))
    assert bool(jnp.all(greedy_ids == jnp.argmax(greedy_logits, axis=-1)))

    print("KERNEL_OK")
</pallas_src>

<mosaic_0001>
module attributes {stable_mosaic.version = 11 : i64} {
  func.func @_logits_kernel(%arg0: i32, %arg1: memref<8x64xf32, #tpu.memory_space<vmem>>, %arg2: memref<384x64xf32, #tpu.memory_space<vmem>>, %arg3: memref<1x384xf32, #tpu.memory_space<vmem>>, %arg4: memref<8x1xf32, #tpu.memory_space<vmem>>, %arg5: memref<8x384xf32, #tpu.memory_space<vmem>>, %arg6: memref<1x8x1xf32, #tpu.memory_space<vmem>>, %arg7: memref<1x8x1xi32, #tpu.memory_space<vmem>>, %arg8: memref<1x8x1xf32, #tpu.memory_space<vmem>>) attributes {dimension_semantics = [#tpu.dimension_semantics<parallel>], iteration_bounds = array<i64: 1>, scalar_prefetch = 0 : i64, scratch_operands = 0 : i64, tpu.core_type = #tpu.core_type<tc>, window_params = [{pipeline_mode = #tpu.pipeline_mode<synchronous>, transform_indices = @transform_0, window_bounds = array<i64: 8, 64>}, {transform_indices = @transform_1, window_bounds = array<i64: 384, 64>}, {pipeline_mode = #tpu.pipeline_mode<synchronous>, transform_indices = @transform_2, window_bounds = array<i64: 1, 384>}, {pipeline_mode = #tpu.pipeline_mode<synchronous>, transform_indices = @transform_3, window_bounds = array<i64: 8, 1>}, {transform_indices = @transform_4, window_bounds = array<i64: 8, 384>}, {transform_indices = @transform_5, window_bounds = array<i64: 1, 8, 1>}, {transform_indices = @transform_6, window_bounds = array<i64: 1, 8, 1>}, {transform_indices = @transform_7, window_bounds = array<i64: 1, 8, 1>}]} {
    %c0 = arith.constant 0 : index
    %c0_0 = arith.constant 0 : index
    %0 = vector.load %arg1[%c0, %c0_0] : memref<8x64xf32, #tpu.memory_space<vmem>>, vector<8x64xf32>
    %c0_1 = arith.constant 0 : index
    %c0_2 = arith.constant 0 : index
    %1 = vector.load %arg2[%c0_1, %c0_2] : memref<384x64xf32, #tpu.memory_space<vmem>>, vector<384x64xf32>
    %cst = arith.constant dense<0.000000e+00> : vector<8x384xf32>
    %2 = tpu.matmul %0, %1, %cst {dimension_numbers = #tpu.dot_dimension_numbers<[1], [1], [0], [0], [0, 0, 1, 0], [], []>} : vector<8x64xf32>, vector<384x64xf32>, vector<8x384xf32> -> vector<8x384xf32>
    %c384_i32 = arith.constant 384 : i32
    %3 = arith.muli %arg0, %c384_i32 : i32
    %4 = tpu.assume_multiple %3, 128 : i32
    %c0_3 = arith.constant 0 : index
    %5 = arith.index_cast %4 : i32 to index
    %6 = vector.load %arg3[%c0_3, %5] : memref<1x384xf32, #tpu.memory_space<vmem>>, vector<1x384xf32>
    %7 = vector.broadcast %6 : vector<1x384xf32> to vector<8x384xf32>
    %8 = arith.addf %2, %7 : vector<8x384xf32>
    %cst_4 = arith.constant 0.0333333351 : f32
    %9 = vector.broadcast %cst_4 : f32 to vector<8x384xf32>
    %10 = arith.mulf %8, %9 : vector<8x384xf32>
    %11 = math.tanh %10 : vector<8x384xf32>
    %cst_5 = arith.constant 3.000000e+01 : f32
    %12 = vector.broadcast %cst_5 : f32 to vector<8x384xf32>
    %13 = arith.mulf %11, %12 : vector<8x384xf32>
    %c0_6 = arith.constant 0 : index
    %c0_7 = arith.constant 0 : index
    %14 = vector.load %arg4[%c0_6, %c0_7] : memref<8x1xf32, #tpu.memory_space<vmem>>, vector<8x1xf32>
    %15 = vector.broadcast %14 : vector<8x1xf32> to vector<8x384xf32>
    %16 = arith.mulf %13, %15 : vector<8x384xf32>
    %c0_8 = arith.constant 0 : index
    %c0_9 = arith.constant 0 : index
    %17 = vector.load %arg5[%c0_8, %c0_9] : memref<8x384xf32, #tpu.memory_space<vmem>>, vector<8x384xf32>
    tpu.vector_store %arg5[%c0_8, %c0_9], %16 {strides = array<i32>} : memref<8x384xf32, #tpu.memory_space<vmem>>, vector<8x384xf32>,
    %18 = tpu.iota {dimensions = array<i32: 1>} : vector<8x384xi32>
    %c384_i32_10 = arith.constant 384 : i32
    %19 = arith.muli %arg0, %c384_i32_10 : i32
    %20 = vector.broadcast %19 : i32 to vector<8x384xi32>
    %21 = arith.addi %18, %20 : vector<8x384xi32>
    %cst_11 = arith.constant dense<0xFF800000> : vector<8xf32>
    %22 = vector.multi_reduction <maximumf>, %16, %cst_11 [1] : vector<8x384xf32> to vector<8xf32>
    %23 = vector.shape_cast %22 : vector<8xf32> to vector<8x1xf32>
    %24 = vector.broadcast %23 : vector<8x1xf32> to vector<8x384xf32>
    %25 = arith.cmpf oeq, %16, %24 : vector<8x384xf32>
    %c1073741824_i32 = arith.constant 1073741824 : i32
    %26 = vector.broadcast %c1073741824_i32 : i32 to vector<8x384xi32>
    %27 = arith.select %25, %21, %26 : vector<8x384xi1>, vector<8x384xi32>
    %cst_12 = arith.constant dense<2147483647> : vector<8xi32>
    %28 = vector.multi_reduction <minsi>, %27, %cst_12 [1] : vector<8x384xi32> to vector<8xi32>
    %29 = vector.shape_cast %28 : vector<8xi32> to vector<8x1xi32>
    %30 = vector.broadcast %23 : vector<8x1xf32> to vector<8x384xf32>
    %31 = arith.subf %16, %30 : vector<8x384xf32>
    %32 = math.exp %31 : vector<8x384xf32>
    %cst_13 = arith.constant dense<0.000000e+00> : vector<8xf32>
    %33 = vector.multi_reduction <add>, %32, %cst_13 [1] : vector<8x384xf32> to vector<8xf32>
    %34 = vector.shape_cast %33 : vector<8xf32> to vector<8x1xf32>
    %35 = vector.shape_cast %23 : vector<8x1xf32> to vector<1x8x1xf32>
    %c0_14 = arith.constant 0 : index
    %c0_15 = arith.constant 0 : index
    %c0_16 = arith.constant 0 : index
    %36 = vector.load %arg6[%c0_14, %c0_15, %c0_16] : memref<1x8x1xf32, #tpu.memory_space<vmem>>, vector<1x8x1xf32>
    tpu.vector_store %arg6[%c0_14, %c0_15, %c0_16], %35 {strides = array<i32>} : memref<1x8x1xf32, #tpu.memory_space<vmem>>, vector<1x8x1xf32>,
    %37 = vector.shape_cast %29 : vector<8x1xi32> to vector<1x8x1xi32>
    %c0_17 = arith.constant 0 : index
    %c0_18 = arith.constant 0 : index
    %c0_19 = arith.constant 0 : index
    %38 = vector.load %arg7[%c0_17, %c0_18, %c0_19] : memref<1x8x1xi32, #tpu.memory_space<vmem>>, vector<1x8x1xi32>
    tpu.vector_store %arg7[%c0_17, %c0_18, %c0_19], %37 {strides = array<i32>} : memref<1x8x1xi32, #tpu.memory_space<vmem>>, vector<1x8x1xi32>,
    %39 = vector.shape_cast %34 : vector<8x1xf32> to vector<1x8x1xf32>
    %c0_20 = arith.constant 0 : index
    %c0_21 = arith.constant 0 : index
    %c0_22 = arith.constant 0 : index
    %40 = vector.load %arg8[%c0_20, %c0_21, %c0_22] : memref<1x8x1xf32, #tpu.memory_space<vmem>>, vector<1x8x1xf32>
    tpu.vector_store %arg8[%c0_20, %c0_21, %c0_22], %39 {strides = array<i32>} : memref<1x8x1xf32, #tpu.memory_space<vmem>>, vector<1x8x1xf32>,
    return
  }
  func.func @transform_0(%arg0: i32) -> (i32, i32) {
    %c0_i32 = arith.constant 0 : i32
    %c0_i32_0 = arith.constant 0 : i32
    %c0_i32_1 = arith.constant 0 : i32
    return %c0_i32, %c0_i32_0 : i32, i32
  }
  func.func @transform_1(%arg0: i32) -> (i32, i32) {
    %c0_i32 = arith.constant 0 : i32
    %c0_i32_0 = arith.constant 0 : i32
    return %arg0, %c0_i32 : i32, i32
  }
  func.func @transform_2(%arg0: i32) -> (i32, i32) {
    %c0_i32 = arith.constant 0 : i32
    %c0_i32_0 = arith.constant 0 : i32
    %c0_i32_1 = arith.constant 0 : i32
    return %c0_i32, %c0_i32_0 : i32, i32
  }
  func.func @transform_3(%arg0: i32) -> (i32, i32) {
    %c0_i32 = arith.constant 0 : i32
    %c0_i32_0 = arith.constant 0 : i32
    %c0_i32_1 = arith.constant 0 : i32
    return %c0_i32, %c0_i32_0 : i32, i32
  }
  func.func @transform_4(%arg0: i32) -> (i32, i32) {
    %c0_i32 = arith.constant 0 : i32
    %c0_i32_0 = arith.constant 0 : i32
    return %c0_i32, %arg0 : i32, i32
  }
  func.func @transform_5(%arg0: i32) -> (i32, i32, i32) {
    %c0_i32 = arith.constant 0 : i32
    %c0_i32_0 = arith.constant 0 : i32
    %c0_i32_1 = arith.constant 0 : i32
    return %arg0, %c0_i32, %c0_i32_0 : i32, i32, i32
  }
  func.func @transform_6(%arg0: i32) -> (i32, i32, i32) {
    %c0_i32 = arith.constant 0 : i32
    %c0_i32_0 = arith.constant 0 : i32
    %c0_i32_1 = arith.constant 0 : i32
    return %arg0, %c0_i32, %c0_i32_0 : i32, i32, i32
  }
  func.func @transform_7(%arg0: i32) -> (i32, i32, i32) {
    %c0_i32 = arith.constant 0 : i32
    %c0_i32_0 = arith.constant 0 : i32
    %c0_i32_1 = arith.constant 0 : i32
    return %arg0, %c0_i32, %c0_i32_0 : i32, i32, i32
  }
}

</mosaic_0001>

<bundles_post_ra>
// kernel: tpu_custom_call.1
= control target key start
LH: loop header
LB: loop body
LE: loop exit
PB: predicated region body
PF: predicated region fallthrough
CT: control target
= control target key end

     0   :  { %vm92_vm0 = vcmask 523264   ;;  %v740_v6 = vmov 0.0|0.0   ;;  %vm741_vm2 = vmmov 0   ;;  %v742_v12 = vmov 0.0   ;;  %s1032_s0 = inlined_call_operand.vmem [shape: f32[8,64], index: 0, kind: input, shape index: {}]   ;;  %s1033_s1 = inlined_call_operand.vmem [shape: f32[384,64], index: 1, kind: input, shape index: {}]   ;;  %s1034_s2 = inlined_call_operand.vmem [shape: f32[1,384], index: 2, kind: input, shape index: {}]   ;;  %s1035_s3 = inlined_call_operand.vmem [shape: f32[8,1], index: 3, kind: input, shape index: {}]   ;;  %s1036_s4 = inlined_call_operand.hbm [shape: f32[8,384], index: 4, kind: output, shape index: {0}]   ;;  %s1037_s5 = inlined_call_operand.vmem [shape: f32[1,8,1], index: 5, kind: output, shape index: {1}]   ;;  %s1038_s6 = inlined_call_operand.vmem [shape: s32[1,8,1], index: 6, kind: output, shape index: {2}]   ;;  %s1039_s7 = inlined_call_operand.vmem [shape: f32[1,8,1], index: 7, kind: output, shape index: {3}]  }
   0x1   :  { %v39_v0 = vld [vmem:[%s1033_s1 + $0x80] sm:$0xff]  ;;  %v40_v1 = vld [vmem:[%s1033_s1 + $0x88] sm:$0xff]  ;;  %vm796_vm1 = vmpackc.low %vm92_vm0, %vm92_vm0  ;;  %666 = vmatprep.subr.bf16.mxu1 %v740_v6  ;;  %615 = vmatprep.mubr.msk.f32.mxu1 %vm741_vm2, %v742_v12  ;;  %v743_v13 = vmov 0  }
   0x2   :  { %v23_v2 = vld [vmem:[%s1033_s1] sm:$0xff]  ;;  %v618_v3 = vpack.c.bf16 %v40_v1, %v39_v0  ;;  %v24_v5 = vld [vmem:[%s1033_s1 + $0x8] sm:$0xff]  ;;  %v41_v10 = vld [vmem:[%s1033_s1 + $0x90] sm:$0xff]  ;;  %703 = vset.pattern.permute.xlu0 %v743_v13 }
   0x3   :  { %v55_v7 = vld [vmem:[%s1033_s1 + $0x100] sm:$0xff]  ;;  %v621_v8 = vpack.c.bf16 %v24_v5, %v23_v2  ;;  %v56_v9 = vld [vmem:[%s1033_s1 + $0x108] sm:$0xff]  ;;  %v42_v11 = vld [vmem:[%s1033_s1 + $0x98] sm:$0xff] }
   0x4   :  { %620 = vmatprep.subr.msk.bf16.mxu0 %vm796_vm1, %v618_v3  ;;  %v667_v14 = vpack.c.bf16 %v56_v9, %v55_v7  ;;  %v624_v15 = vpack.c.bf16 %v42_v11, %v41_v10  ;;  %v25_v16 = vld [vmem:[%s1033_s1 + $0x10] sm:$0xff]  ;;  %v26_v17 = vld [vmem:[%s1033_s1 + $0x18] sm:$0xff]  ;;  %v43_v20 = vld [vmem:[%s1033_s1 + $0xa0] sm:$0xff] }
   0x5   :  { %623 = vmatpush3.bf16.xpose.msk.msra.mxu0 %vm796_vm1, %v621_v8  ;;  %v57_v18 = vld [vmem:[%s1033_s1 + $0x110] sm:$0xff]  ;;  %v58_v19 = vld [vmem:[%s1033_s1 + $0x118] sm:$0xff]  ;;  %v44_v21 = vld [vmem:[%s1033_s1 + $0xa8] sm:$0xff]  ;;  %v627_v22 = vpack.c.bf16 %v26_v17, %v25_v16 }
   0x6   :  { %669 = vmatpush3.bf16.xpose.msk.msra.mxu1 %vm796_vm1, %v667_v14  ;;  %626 = vmatprep.subr.msk.bf16.mxu0 %vm796_vm1, %v624_v15  ;;  %v671_v23 = vpack.c.bf16 %v58_v19, %v57_v18  ;;  %v630_v24 = vpack.c.bf16 %v44_v21, %v43_v20  ;;  %v27_v25 = vld [vmem:[%s1033_s1 + $0x20] sm:$0xff]  ;;  %v28_v26 = vld [vmem:[%s1033_s1 + $0x28] sm:$0xff]  ;;  %v45_v29 = vld [vmem:[%s1033_s1 + $0xb0] sm:$0xff] }
   0x7   :  { %670 = vmatprep.subr.bf16.mxu1 %v740_v6  ;;  %v59_v27 = vld [vmem:[%s1033_s1 + $0x120] sm:$0xff]  ;;  %v60_v28 = vld [vmem:[%s1033_s1 + $0x128] sm:$0xff]  ;;  %v46_v30 = vld [vmem:[%s1033_s1 + $0xb8] sm:$0xff]  ;;  %v633_v31 = vpack.c.bf16 %v28_v26, %v27_v25 }
   0x8   :  { %v871_v32 = vld [vmem:[%s1032_s0] sm:$0xff]  ;;  %v675_v34 = vpack.c.bf16 %v60_v28, %v59_v27  ;;  %v636_v35 = vpack.c.bf16 %v46_v30, %v45_v29 }
   0x9   :  { %v390_v33 = vld [vmem:[%s1035_s3] sm:$0xff]  ;;  %564 = vmatprep.mubr.msk.f32.mxu0 %vm92_vm0, %v871_v32 }
   0xa   :  { %393 = vperm.xlu0 %703, %v390_v33  }
   0xd   :  { %629 = vmatpush3.bf16.xpose.msk.msra.mxu0 %vm796_vm1, %v627_v22 }
   0xe   :  { %673 = vmatpush3.bf16.xpose.msk.msra.mxu1 %vm796_vm1, %v671_v23  ;;  %632 = vmatprep.subr.msk.bf16.mxu0 %vm796_vm1, %v630_v24 }
   0xf   :  { %674 = vmatprep.subr.bf16.mxu1 %v740_v6 }
  0x10   :  { %13 = vsyncpa [#allocation3], 0  ;;  %v29_v36 = vld [vmem:[%s1033_s1 + $0x30] sm:$0xff]  ;;  %v30_v37 = vld [vmem:[%s1033_s1 + $0x38] sm:$0xff]  ;;  %vm451_vm3 = vcmask 7168  }
  0x11   :  { %v61_v38 = vld [vmem:[%s1033_s1 + $0x130] sm:$0xff]  ;;  %v62_v39 = vld [vmem:[%s1033_s1 + $0x138] sm:$0xff]  ;;  %v47_v40 = vld [vmem:[%s1033_s1 + $0xc0] sm:$0xff]  ;;  %v639_v42 = vpack.c.bf16 %v30_v37, %v29_v36 }
  0x12   :  { %v48_v41 = vld [vmem:[%s1033_s1 + $0xc8] sm:$0xff]  ;;  %v679_v43 = vpack.c.bf16 %v62_v39, %v61_v38  ;;  %v31_v45 = vld [vmem:[%s1033_s1 + $0x40] sm:$0xff]  ;;  %v49_v49 = vld [vmem:[%s1033_s1 + $0xd0] sm:$0xff] }
  0x13   :  { %v642_v44 = vpack.c.bf16 %v48_v41, %v47_v40  ;;  %v32_v46 = vld [vmem:[%s1033_s1 + $0x48] sm:$0xff]  ;;  %v63_v47 = vld [vmem:[%s1033_s1 + $0x140] sm:$0xff]  ;;  %v50_v50 = vld [vmem:[%s1033_s1 + $0xd8] sm:$0xff] }
  0x14   :  { %v64_v48 = vld [vmem:[%s1033_s1 + $0x148] sm:$0xff]  ;;  %v645_v51 = vpack.c.bf16 %v32_v46, %v31_v45  ;;  %v648_v53 = vpack.c.bf16 %v50_v50, %v49_v49  ;;  %v33_v54 = vld [vmem:[%s1033_s1 + $0x50] sm:$0xff]  ;;  %v34_v55 = vld [vmem:[%s1033_s1 + $0x58] sm:$0xff] }
  0x15   :  { %635 = vmatpush3.bf16.xpose.msk.msra.mxu0 %vm796_vm1, %v633_v31  ;;  %v683_v52 = vpack.c.bf16 %v64_v48, %v63_v47  ;;  %v65_v56 = vld [vmem:[%s1033_s1 + $0x150] sm:$0xff]  ;;  %v66_v57 = vld [vmem:[%s1033_s1 + $0x158] sm:$0xff]  ;;  %v51_v58 = vld [vmem:[%s1033_s1 + $0xe0] sm:$0xff]  ;;  %v651_v60 = vpack.c.bf16 %v34_v55, %v33_v54 }
  0x16   :  { %677 = vmatpush3.bf16.xpose.msk.msra.mxu1 %vm796_vm1, %v675_v34  ;;  %638 = vmatprep.subr.msk.bf16.mxu0 %vm796_vm1, %v636_v35  ;;  %v52_v59 = vld [vmem:[%s1033_s1 + $0xe8] sm:$0xff]  ;;  %v687_v61 = vpack.c.bf16 %v66_v57, %v65_v56  ;;  %v35_v63 = vld [vmem:[%s1033_s1 + $0x60] sm:$0xff]  ;;  %v53_v3 = vld [vmem:[%s1033_s1 + $0xf0] sm:$0xff] }
  0x17   :  { %678 = vmatprep.subr.bf16.mxu1 %v740_v6  ;;  %v654_v62 = vpack.c.bf16 %v52_v59, %v51_v58  ;;  %v36_v0 = vld [vmem:[%s1033_s1 + $0x68] sm:$0xff]  ;;  %v67_v1 = vld [vmem:[%s1033_s1 + $0x160] sm:$0xff]  ;;  %v54_v5 = vld [vmem:[%s1033_s1 + $0xf8] sm:$0xff] }
  0x18   :  { %v68_v2 = vld [vmem:[%s1033_s1 + $0x168] sm:$0xff]  ;;  %v657_v7 = vpack.c.bf16 %v36_v0, %v35_v63  ;;  %v660_v9 = vpack.c.bf16 %v54_v5, %v53_v3  ;;  %v37_v10 = vld [vmem:[%s1033_s1 + $0x70] sm:$0xff]  ;;  %v38_v11 = vld [vmem:[%s1033_s1 + $0x78] sm:$0xff] }
  0x19   :  { %v691_v8 = vpack.c.bf16 %v68_v2, %v67_v1  ;;  %v69_v12 = vld [vmem:[%s1033_s1 + $0x170] sm:$0xff]  ;;  %v70_v13 = vld [vmem:[%s1033_s1 + $0x178] sm:$0xff]  ;;  %v663_v14 = vpack.c.bf16 %v38_v11, %v37_v10  ;;  %v75_v18 = vld [vmem:[%s1034_s2] sm:$0x7] }
  0x1a   :  { %v695_v15 = vpack.c.bf16 %v70_v13, %v69_v12 }
  0x1d   :  { %641 = vmatpush3.bf16.xpose.msk.msra.mxu0 %vm796_vm1, %v639_v42 }
  0x1e   :  { %681 = vmatpush3.bf16.xpose.msk.msra.mxu1 %vm796_vm1, %v679_v43  ;;  %644 = vmatprep.subr.msk.bf16.mxu0 %vm796_vm1, %v642_v44 }
  0x1f   :  { %682 = vmatprep.subr.bf16.mxu1 %v740_v6 }
  0x25   :  { %647 = vmatpush3.bf16.xpose.msk.msra.mxu0 %vm796_vm1, %v645_v51 }
  0x26   :  { %685 = vmatpush3.bf16.xpose.msk.msra.mxu1 %vm796_vm1, %v683_v52  ;;  %650 = vmatprep.subr.msk.bf16.mxu0 %vm796_vm1, %v648_v53 }
  0x27   :  { %686 = vmatprep.subr.bf16.mxu1 %v740_v6 }
  0x2d   :  { %653 = vmatpush3.bf16.xpose.msk.msra.mxu0 %vm796_vm1, %v651_v60 }
  0x2e   :  { %689 = vmatpush3.bf16.xpose.msk.msra.mxu1 %vm796_vm1, %v687_v61  ;;  %656 = vmatprep.subr.msk.bf16.mxu0 %vm796_vm1, %v654_v62 }
  0x2f   :  { %690 = vmatprep.subr.bf16.mxu1 %v740_v6 }
  0x35   :  { %659 = vmatpush3.bf16.xpose.msk.msra.mxu0 %vm796_vm1, %v657_v7 }
  0x36   :  { %693 = vmatpush3.bf16.xpose.msk.msra.mxu1 %vm796_vm1, %v691_v8  ;;  %662 = vmatprep.subr.msk.bf16.mxu0 %vm796_vm1, %v660_v9 }
  0x37   :  { %694 = vmatprep.subr.bf16.mxu1 %v740_v6  ;;  %v77_v6 = vlaneseq }
  0x39   :  { %v78_v16 = vshrl.u32 %v77_v6, 7  ;;  %v403_v45 = vand.u32 127, %v77_v6 }
  0x3b   :  { %v79_v17 = vsub.s32 0, %v78_v16  ;;  %v83_v19 = vsub.s32 1, %v78_v16  ;;  %v87_v20 = vsub.s32 2, %v78_v16  ;;  %v404_v47 = vadd.s32 128, %v403_v45 }
  0x3c   :  { %v405_v48 = vadd.s32 256, %v403_v45 }
  0x3d   :  { %665 = vmatpush3.bf16.xpose.msk.msra.mxu0 %vm796_vm1, %v663_v14  ;;  %v80_v21 = vrot.slane %v75_v18, %v79_v17  ;;  %v84_v22 = vrot.slane %v75_v18, %v83_v19  ;;  %v88_v23 = vrot.slane %v75_v18, %v87_v20 }
  0x3e   :  { %697 = vmatpush3.bf16.xpose.msk.msra.mxu1 %vm796_vm1, %v695_v15 }
  0x44   :  { %565 = vmatmul.mubr.msk.f32.vlgmr.msra.gmra.mrb[0].mxu0 %vm92_vm0, %v871_v32 }
  0x45   :  { %616 = vmatmul.mubr.msk.f32.vlgmr.msra.gmra.mrb[0].mxu1 %vm92_vm0, %v871_v32 }
  0x89   :  { %v394_v34 = vpop.permute.xlu0 %393 }
 0x117   :  { %v306_v4 = vpop.f32.mrb[0].mxu0 }
 0x118   :  { %v307_v24 = vadd.f32 %v306_v4, %v80_v21  ;;  %v308_v25 = vpop.f32.mrb[1].mxu0  ;;  %v377_v26 = vpop.f32.mrb[0].mxu1 }
 0x119   :  { %v309_v27 = vadd.f32 %v308_v25, %v84_v22  ;;  %v378_v28 = vadd.f32 %v377_v26, %v88_v23  ;;  %v617_v29 = vpop.f32.mrb[1].mxu1 }
 0x11a   :  { %v381_v30 = vmul.f32 0.033333335, %v307_v24 }
 0x11b   :  { %v382_v31 = vmul.f32 0.033333335, %v309_v27  ;;  %v383_v32 = vmul.f32 0.033333335, %v378_v28 }
 0x11c   :  { %704 = vtanh.f32 %v381_v30 }
 0x11d   :  { %706 = vtanh.f32 %v382_v31 }
 0x11e   :  { %708 = vtanh.f32 %v383_v32 }
 0x126   :  { %v705_v33 = vpop.eup %704 }
 0x127   :  { %v707_v35 = vpop.eup %706  ;;  %v387_v36 = vmul.f32 30.0, %v705_v33 }
 0x128   :  { %v709_v37 = vpop.eup %708  ;;  %v388_v38 = vmul.f32 30.0, %v707_v35 }
 0x129   :  { %v389_v39 = vmul.f32 30.0, %v709_v37  ;;  %v396_v40 = vmul.f32 %v394_v34, %v387_v36 }
 0x12a   :  { %v397_v41 = vmul.f32 %v394_v34, %v388_v38 }
 0x12b   :  { %v398_v42 = vmul.f32 %v394_v34, %v389_v39  ;;  %399 = vst [vmem:[#allocation2] sm:$0xff] %v396_v40 }
 0x12c   :  { %400 = vst [vmem:[#allocation2 + $0x8] sm:$0xff] %v397_v41  ;;  %v410_v43 = vmax.f32 %v396_v40, %v397_v41 }
 0x12d   :  { %401 = vst [vmem:[#allocation2 + $0x10] sm:$0xff] %v398_v42 }
 0x12e   :  { %v411_v44 = vmax.f32 %v410_v43, %v398_v42 }
 0x130   :  { %412 = vmax.xlane.f32.xlu0 %v411_v44 }
 0x1bd   :  { %v413_v46 = vpop.xlane.xlu0 %412 }
 0x1be   :  { %vm414_vm4 = vcmp.eq.f32.partialorder %v396_v40, %v413_v46  ;;  %452 = vst.msk [vmem:[%s1037_s5] sm:$0xff] %vm451_vm3, %v413_v46  ;;  %vm415_vm5 = vcmp.eq.f32.partialorder %v397_v41, %v413_v46  ;;  %vm416_vm6 = vcmp.eq.f32.partialorder %v398_v42, %v413_v46  ;;  %v438_v56 = vsub.f32 %v396_v40, %v413_v46  ;;  %s744_s5 = smov [#allocation2]  }
 0x1bf   :  { %v417_v49 = vsel %vm414_vm4, %v403_v45, 1073741824  ;;  %v418_v50 = vsel %vm415_vm5, %v404_v47, 1073741824  ;;  %v419_v51 = vsel %vm416_vm6, %v405_v48, 1073741824  ;;  %v439_v57 = vsub.f32 %v397_v41, %v413_v46  ;;  %s461_s28 = sshll.u32 %s744_s5, 4  ;;  %s462_s28 = int_to_ptr.vmem [resolvable:$true] %s461_s28 }
 0x1c0   :  { %vm420_vm7 = vcmp.lt.s32.totalorder %v417_v49, %v418_v50  ;;  %v441_v58 = vmul.f32 1.442695, %v438_v56  ;;  %v440_v60 = vsub.f32 %v398_v42, %v413_v46  ;;  %s716_s29 = scalar_lea.vmem %s462_s28, 384  ;;  %p721_p1 = scmp.lt.s32.totalorder %s462_s28, %s462_s28 }
 0x1c1   :  { %v421_v52 = vsel %vm420_vm7, %v417_v49, %v418_v50  ;;  %v443_v59 = vmul.f32 1.442695, %v439_v57  ;;  %p717_p0 = scmp.ne.s32.totalorder %s462_s28, %s716_s29  ;;  %p722_p2 = scmp.lt.s32.totalorder %s716_s29, %s716_s29 }
 0x1c2   :  { %vm422_vm8 = vcmp.lt.s32.totalorder %v421_v52, %v419_v51  ;;  %710 = vpow2.f32 %v441_v58  ;;  %v445_v61 = vmul.f32 1.442695, %v440_v60 }
 0x1c3   :  { %v423_v53 = vsel %vm422_vm8, %v421_v52, %v419_v51  ;;  %712 = vpow2.f32 %v443_v59  ;;  %p723_p3 = por %p722_p2, %p721_p1 }
 0x1c4   :  { %v425_v54 = vshra.s32 %v423_v53, 16  ;;  %714 = vpow2.f32 %v445_v61  ;;  %v424_v62 = vand.u32 65535, %v423_v53 }
 0x1c5   :  { %p724_p4 = pnand %p723_p3, %p717_p0 }
 0x1c6   :  { %v427_v55 = vcvt.s32.f32 %v425_v54  ;;  %v426_v2 = vcvt.s32.f32 %v424_v62 }
 0x1c8   :  { %428 = vmin.xlane.f32.xlu1 %v427_v55 }
 0x1cc   :  { %v711_v63 = vpop.eup %710 }
 0x1cd   :  { %v713_v0 = vpop.eup %712 }
 0x1ce   :  { %v447_v3 = vadd.f32 %v713_v0, %v711_v63  ;;  %v715_v7 = vpop.eup %714 }
 0x1d0   :  { %v448_v8 = vadd.f32 %v715_v7, %v447_v3 }
 0x255   :  { %v429_v1 = vpop.xlane.xlu1 %428 }
 0x256   :  { %vm430_vm9 = vcmp.eq.f32.partialorder %v427_v55, %v429_v1 }
 0x257   :  { %v431_v5 = vsel %vm430_vm9, %v426_v2, inf }
 0x258   :  { %432 = vmin.xlane.f32.xlu1 %v431_v5 }
 0x25c   :  { %449 = vadd.xlane.f32.xlu1 %v448_v8 }
 0x25d   :  { %727 = shalt.err (!%p724_p4)
}
 0x25e   :  { %s728_s9 = scalar_lea.hbm %s1036_s4, 384 }
 0x25f   :  { %p729_p5 = scmp.ne.s32.totalorder %s1036_s4, %s728_s9  ;;  %p732_p6 = scmp.lt.u32.totalorder %s728_s9, %s1036_s4 }
 0x261   :  { %p734_p7 = pnand %p732_p6, %p729_p5 }
 0x263   :  { %737 = shalt.err (!%p734_p7)
}
 0x264   :  { %464 = dma.vmem_to_hbm [thread:$0]  %s462_s28, 384, %s1036_s4, [#allocation3]   ;;  %v435_v9 = vcvt.f32.s32 %v429_v1 }
 0x266   :  { %v436_v11 = vshll.u32 %v435_v9, 16 }
 0x2e5   :  { %v433_v10 = vpop.xlane.xlu1 %432 }
 0x2e6   :  { %v434_v12 = vcvt.f32.s32 %v433_v10 }
 0x2e8   :  { %v437_v13 = vadd.s32 %v436_v11, %v434_v12 }
 0x2e9   :  { %v450_v14 = vpop.xlane.xlu1 %449 }
 0x2ea   :  { %453 = vst.msk [vmem:[%s1038_s6] sm:$0xff] %vm451_vm3, %v437_v13  ;;  %454 = vst.msk [vmem:[%s1039_s7] sm:$0xff] %vm451_vm3, %v450_v14 }
 0x2eb   :  { %738 = dma.done.wait [#allocation3], 384  }
 0x2ec   :  { %739 = vsyncadd [#allocation3], 4294966912 }
 0x2ed   :  { %480 = vsyncpa [#allocation3], 1 }

</bundles_post_ra>
